<compile_context>
chip_gen: v7x
topology: tpu7x:2x2x1
jax: 0.10.0
libtpu: 0.0.40
codegen_flags: <defaults>
</compile_context>

<pallas_src>
import jax
import jax.numpy as jnp
from jax.experimental import pallas as pl
from jax.experimental.pallas import tpu as pltpu

LEAKY_SLOPE = 0.1
EPS = 1e-5


def _leaky_relu(x):
    return jnp.where(x > 0, x, LEAKY_SLOPE * x)


# ---------------------------------------------------------------------------
# Fused kernel: one grid step == one batch element.
#
#   x_ref    : (1, H, W*C1)     input rows, f32 (also reused as the residual)
#   w1_ref   : (W*C1, W*C2)     bf16 block-diagonal 1x1-conv weight, BN-scaled
#   b1_ref   : (1, W*C2)        f32 folded BN bias, stage 0
#   w2_ref   : (3*W*C2, W*C1)   bf16 banded 3x3-conv weight, BN-scaled
#   b2_ref   : (1, W*C1)        f32 folded BN bias, stage 1
#   o_ref    : (1, H, W*C1)     output rows, f32
#   ypad_ref : (H+2, W*C2) VMEM scratch, row-padded intermediate activation
# ---------------------------------------------------------------------------
def darknet_block_kernel(x_ref, w1_ref, b1_ref, w2_ref, b2_ref, o_ref,
                         ypad_ref):
    H = x_ref.shape[1]

    x = x_ref[0]                                              # (H, W*C1) f32

    # ---- stage 0: 1x1 conv (+ folded BN scale) + bias + LeakyReLU ---------
    y = jnp.dot(x.astype(jnp.bfloat16), w1_ref[...],
                preferred_element_type=jnp.float32)           # (H, W*C2)
    y = _leaky_relu(y + b1_ref[...])

    # ---- stage the row-padded intermediate in VMEM (never hits HBM) -------
    # The column ("same") padding of the 3x3 conv is folded into the banded
    # weight, so only a zero row above and below is needed.  The scratch is
    # re-zeroed every step: it is uninitialized and per-core under megacore.
    ypad_ref[...] = jnp.zeros_like(ypad_ref)
    ypad_ref[1:H + 1, :] = y

    # ---- stage 1: 3x3 conv as ONE banded matmul ----------------------------
    patches = jnp.concatenate(
        [ypad_ref[dy:dy + H, :] for dy in range(3)], axis=1)  # (H, 3*W*C2)
    out = jnp.dot(patches.astype(jnp.bfloat16), w2_ref[...],
                  preferred_element_type=jnp.float32)         # (H, W*C1)

    # ---- bias + LeakyReLU + residual ---------------------------------------
    out = _leaky_relu(out + b2_ref[...]) + x
    o_ref[0] = out.astype(o_ref.dtype)


# ---------------------------------------------------------------------------
# Wrapper (NCHW in / NCHW out like the PyTorch module).  Transposes stay in
# the same jit so XLA can fuse them with neighbouring ops.
# NOTE: at production Darknet sizes (large W / C2) the (1, H, W*C) block and
# the banded weight grow; tile H into row strips with a 1-row halo and set
# vmem_limit_bytes (v7x has only 64 MiB VMEM).
# ---------------------------------------------------------------------------
def darknet_block(x_nchw, w1_block, b1_row, w2_block, b2_row):
    N, C1, H, W = x_nchw.shape
    WC1 = W * C1
    WC2 = b1_row.shape[1]

    # NHWC with W and C merged -> lane-dense rows (W*C1 = 128 here); this
    # reshape is free (contiguous in NHWC row-major).
    x_rows = jnp.transpose(x_nchw, (0, 2, 3, 1)).reshape(N, H, WC1)

    out_rows = pl.pallas_call(
        darknet_block_kernel,
        out_shape=jax.ShapeDtypeStruct((N, H, WC1), jnp.float32),
        grid=(N,),
        in_specs=[
            pl.BlockSpec((1, H, WC1), lambda n: (n, 0, 0)),
            pl.BlockSpec((WC1, WC2), lambda n: (0, 0)),
            pl.BlockSpec((1, WC2), lambda n: (0, 0)),
            pl.BlockSpec((3 * WC2, WC1), lambda n: (0, 0)),
            pl.BlockSpec((1, WC1), lambda n: (0, 0)),
        ],
        out_specs=pl.BlockSpec((1, H, WC1), lambda n: (n, 0, 0)),
        scratch_shapes=[pltpu.VMEM((H + 2, WC2), jnp.float32)],
        compiler_params=pltpu.CompilerParams(
            dimension_semantics=("parallel",)),   # 2-way megacore on v7x
    )(x_rows, w1_block, b1_row, w2_block, b2_row)

    out_nhwc = out_rows.reshape(N, H, W, C1)
    return jnp.transpose(out_nhwc, (0, 3, 1, 2))


# ---------------------------------------------------------------------------
# Host-side parameter packing: fold eval-mode BN into the conv weights and a
# bias row, and build the block-diagonal / banded matmul weights operating on
# the lane-merged (rows, W*channels) activation layout.
# ---------------------------------------------------------------------------
def pack_params(w1_oihw, w2_oihw, bn1, bn2, *, W):
    g1, b1, m1, v1 = bn1
    g2, b2, m2, v2 = bn2
    C2, C1 = w1_oihw.shape[0], w1_oihw.shape[1]

    scale1 = g1 / jnp.sqrt(v1 + EPS)              # (C2,)
    bias1 = b1 - m1 * scale1
    scale2 = g2 / jnp.sqrt(v2 + EPS)              # (C1,)
    bias2 = b2 - m2 * scale2

    # BN scale folded straight into the conv weights.
    w1_fold = jnp.transpose(w1_oihw[:, :, 0, 0], (1, 0)) * scale1[None, :]  # (C1,C2)
    w2_taps = jnp.transpose(w2_oihw, (2, 3, 1, 0)).reshape(9, C2, C1)
    w2_fold = w2_taps * scale2[None, None, :]                               # (9,C2,C1)

    eye = jnp.eye(W, dtype=jnp.float32)
    # 1x1 conv on (H, W*C1) rows == block-diagonal (W*C1, W*C2) matmul.
    w1_block = jnp.einsum('wv,ij->wivj', eye, w1_fold).reshape(W * C1, W * C2)

    # 3x3 conv: K = 3 row-shifted slabs of width W*C2; the column shift dx and
    # its zero padding are folded into a banded (tri-block-diagonal) weight.
    bands = []
    for dy in range(3):
        band = sum(
            jnp.einsum('wv,ji->wjvi',
                       jnp.eye(W, k=1 - dx, dtype=jnp.float32),
                       w2_fold[dy * 3 + dx])
            for dx in range(3))
        bands.append(band.reshape(W * C2, W * C1))
    w2_block = jnp.concatenate(bands, axis=0)                 # (3*W*C2, W*C1)

    b1_row = jnp.tile(bias1, W).reshape(1, W * C2)
    b2_row = jnp.tile(bias2, W).reshape(1, W * C1)

    return (w1_block.astype(jnp.bfloat16), b1_row,
            w2_block.astype(jnp.bfloat16), b2_row)


# ---------------------------------------------------------------------------
# Pure-JAX reference (NCHW, matches PyTorch conv/BN eval semantics)
# ---------------------------------------------------------------------------
def reference(x, w1_oihw, w2_oihw, bn1, bn2):
    def bn_apply(y, gamma, beta, mean, var):
        inv = gamma / jnp.sqrt(var + EPS)
        return (y - mean[None, :, None, None]) * inv[None, :, None, None] \
            + beta[None, :, None, None]

    dn = ("NCHW", "OIHW", "NCHW")
    y = jax.lax.conv_general_dilated(x, w1_oihw, (1, 1), "VALID",
                                     dimension_numbers=dn)
    y = _leaky_relu(bn_apply(y, *bn1))
    y = jax.lax.conv_general_dilated(y, w2_oihw, (1, 1),
                                     ((1, 1), (1, 1)),
                                     dimension_numbers=dn)
    y = _leaky_relu(bn_apply(y, *bn2))
    return y + x


if __name__ == "__main__":
    # Module: DarknetBlock("blk", nFilter1=8, nFilter2=4)
    N, C1, C2, H, W = 2, 8, 4, 16, 16

    key = jax.random.PRNGKey(0)
    ks = jax.random.split(key, 11)

    x = jax.random.normal(ks[0], (N, C1, H, W), jnp.float32)

    # conv weights (PyTorch OIHW shapes), bias=False
    w1_oihw = 0.2 * jax.random.normal(ks[1], (C2, C1, 1, 1), jnp.float32)
    w2_oihw = 0.2 * jax.random.normal(ks[2], (C1, C2, 3, 3), jnp.float32)

    # BatchNorm params / running stats (eval-mode semantics)
    g1 = 1.0 + 0.1 * jax.random.normal(ks[3], (C2,), jnp.float32)
    b1 = 0.1 * jax.random.normal(ks[4], (C2,), jnp.float32)
    m1 = 0.1 * jax.random.normal(ks[5], (C2,), jnp.float32)
    v1 = jax.random.uniform(ks[6], (C2,), jnp.float32, 0.5, 1.5)
    g2 = 1.0 + 0.1 * jax.random.normal(ks[7], (C1,), jnp.float32)
    b2 = 0.1 * jax.random.normal(ks[8], (C1,), jnp.float32)
    m2 = 0.1 * jax.random.normal(ks[9], (C1,), jnp.float32)
    v2 = jax.random.uniform(ks[10], (C1,), jnp.float32, 0.5, 1.5)

    packed = pack_params(w1_oihw, w2_oihw,
                         (g1, b1, m1, v1), (g2, b2, m2, v2), W=W)

    run = jax.jit(darknet_block)
    out = run(x, *packed)
    out = jax.block_until_ready(out)

    ref = reference(x, w1_oihw, w2_oihw, (g1, b1, m1, v1), (g2, b2, m2, v2))
    assert out.shape == ref.shape == (N, C1, H, W)
    max_err = jnp.max(jnp.abs(out - ref))
    # bf16 MXU operands (f32 accumulation) -> slightly looser tolerance.
    assert jnp.allclose(out, ref, rtol=2e-2, atol=2e-2), \
        f"max abs err {max_err}"

    print("KERNEL_OK")
</pallas_src>

<mosaic_0001>
module attributes {stable_mosaic.version = 11 : i64} {
  func.func @darknet_block_kernel(%arg0: i32, %arg1: memref<1x16x128xf32, #tpu.memory_space<vmem>>, %arg2: memref<128x64xbf16, #tpu.memory_space<vmem>>, %arg3: memref<1x64xf32, #tpu.memory_space<vmem>>, %arg4: memref<192x128xbf16, #tpu.memory_space<vmem>>, %arg5: memref<1x128xf32, #tpu.memory_space<vmem>>, %arg6: memref<1x16x128xf32, #tpu.memory_space<vmem>>, %arg7: memref<18x64xf32, #tpu.memory_space<vmem>>) attributes {dimension_semantics = [#tpu.dimension_semantics<parallel>], iteration_bounds = array<i64: 2>, scalar_prefetch = 0 : i64, scratch_operands = 1 : i64, tpu.core_type = #tpu.core_type<tc>, window_params = [{transform_indices = @transform_0, window_bounds = array<i64: 1, 16, 128>}, {pipeline_mode = #tpu.pipeline_mode<synchronous>, transform_indices = @transform_1, window_bounds = array<i64: 128, 64>}, {pipeline_mode = #tpu.pipeline_mode<synchronous>, transform_indices = @transform_2, window_bounds = array<i64: 1, 64>}, {pipeline_mode = #tpu.pipeline_mode<synchronous>, transform_indices = @transform_3, window_bounds = array<i64: 192, 128>}, {pipeline_mode = #tpu.pipeline_mode<synchronous>, transform_indices = @transform_4, window_bounds = array<i64: 1, 128>}, {transform_indices = @transform_5, window_bounds = array<i64: 1, 16, 128>}]} {
    %c0 = arith.constant 0 : index
    %c0_0 = arith.constant 0 : index
    %c0_1 = arith.constant 0 : index
    %0 = vector.load %arg1[%c0, %c0_0, %c0_1] : memref<1x16x128xf32, #tpu.memory_space<vmem>>, vector<1x16x128xf32>
    %1 = vector.shape_cast %0 : vector<1x16x128xf32> to vector<16x128xf32>
    %2 = arith.truncf %1 : vector<16x128xf32> to vector<16x128xbf16>
    %c0_2 = arith.constant 0 : index
    %c0_3 = arith.constant 0 : index
    %3 = vector.load %arg2[%c0_2, %c0_3] : memref<128x64xbf16, #tpu.memory_space<vmem>>, vector<128x64xbf16>
    %cst = arith.constant dense<0.000000e+00> : vector<16x64xf32>
    %4 = tpu.matmul %2, %3, %cst {dimension_numbers = #tpu.dot_dimension_numbers<[1], [0], [0], [1], [0, 0, 1, 1], [], []>} : vector<16x128xbf16>, vector<128x64xbf16>, vector<16x64xf32> -> vector<16x64xf32>
    %c0_4 = arith.constant 0 : index
    %c0_5 = arith.constant 0 : index
    %5 = vector.load %arg3[%c0_4, %c0_5] : memref<1x64xf32, #tpu.memory_space<vmem>>, vector<1x64xf32>
    %6 = vector.broadcast %5 : vector<1x64xf32> to vector<16x64xf32>
    %7 = arith.addf %4, %6 : vector<16x64xf32>
    %cst_6 = arith.constant 0.000000e+00 : f32
    %8 = vector.broadcast %cst_6 : f32 to vector<16x64xf32>
    %9 = arith.cmpf ogt, %7, %8 : vector<16x64xf32>
    %cst_7 = arith.constant 1.000000e-01 : f32
    %10 = vector.broadcast %cst_7 : f32 to vector<16x64xf32>
    %11 = arith.mulf %10, %7 : vector<16x64xf32>
    %12 = arith.select %9, %7, %11 : vector<16x64xi1>, vector<16x64xf32>
    %cst_8 = arith.constant 0.000000e+00 : f32
    %13 = vector.broadcast %cst_8 : f32 to vector<18x64xf32>
    %c0_9 = arith.constant 0 : index
    %c0_10 = arith.constant 0 : index
    %14 = vector.load %arg7[%c0_9, %c0_10] : memref<18x64xf32, #tpu.memory_space<vmem>>, vector<18x64xf32>
    tpu.vector_store %arg7[%c0_9, %c0_10], %13 {strides = array<i32>} : memref<18x64xf32, #tpu.memory_space<vmem>>, vector<18x64xf32>,
    %c1 = arith.constant 1 : index
    %c0_11 = arith.constant 0 : index
    %15 = vector.load %arg7[%c1, %c0_11] : memref<18x64xf32, #tpu.memory_space<vmem>>, vector<16x64xf32>
    tpu.vector_store %arg7[%c1, %c0_11], %12 {strides = array<i32>} : memref<18x64xf32, #tpu.memory_space<vmem>>, vector<16x64xf32>,
    %c0_12 = arith.constant 0 : index
    %c0_13 = arith.constant 0 : index
    %16 = vector.load %arg7[%c0_12, %c0_13] : memref<18x64xf32, #tpu.memory_space<vmem>>, vector<16x64xf32>
    %c1_14 = arith.constant 1 : index
    %c0_15 = arith.constant 0 : index
    %17 = vector.load %arg7[%c1_14, %c0_15] : memref<18x64xf32, #tpu.memory_space<vmem>>, vector<16x64xf32>
    %c2 = arith.constant 2 : index
    %c0_16 = arith.constant 0 : index
    %18 = vector.load %arg7[%c2, %c0_16] : memref<18x64xf32, #tpu.memory_space<vmem>>, vector<16x64xf32>
    %19 = tpu.concatenate %16, %17, %18 in 1 : vector<16x64xf32>, vector<16x64xf32>, vector<16x64xf32> -> vector<16x192xf32>
    %20 = arith.truncf %19 : vector<16x192xf32> to vector<16x192xbf16>
    %c0_17 = arith.constant 0 : index
    %c0_18 = arith.constant 0 : index
    %21 = vector.load %arg4[%c0_17, %c0_18] : memref<192x128xbf16, #tpu.memory_space<vmem>>, vector<192x128xbf16>
    %cst_19 = arith.constant dense<0.000000e+00> : vector<16x128xf32>
    %22 = tpu.matmul %20, %21, %cst_19 {dimension_numbers = #tpu.dot_dimension_numbers<[1], [0], [0], [1], [0, 0, 1, 1], [], []>} : vector<16x192xbf16>, vector<192x128xbf16>, vector<16x128xf32> -> vector<16x128xf32>
    %c0_20 = arith.constant 0 : index
    %c0_21 = arith.constant 0 : index
    %23 = vector.load %arg5[%c0_20, %c0_21] : memref<1x128xf32, #tpu.memory_space<vmem>>, vector<1x128xf32>
    %24 = vector.broadcast %23 : vector<1x128xf32> to vector<16x128xf32>
    %25 = arith.addf %22, %24 : vector<16x128xf32>
    %cst_22 = arith.constant 0.000000e+00 : f32
    %26 = vector.broadcast %cst_22 : f32 to vector<16x128xf32>
    %27 = arith.cmpf ogt, %25, %26 : vector<16x128xf32>
    %cst_23 = arith.constant 1.000000e-01 : f32
    %28 = vector.broadcast %cst_23 : f32 to vector<16x128xf32>
    %29 = arith.mulf %28, %25 : vector<16x128xf32>
    %30 = arith.select %27, %25, %29 : vector<16x128xi1>, vector<16x128xf32>
    %31 = arith.addf %30, %1 : vector<16x128xf32>
    %c0_24 = arith.constant 0 : index
    %c0_25 = arith.constant 0 : index
    %c0_26 = arith.constant 0 : index
    %32 = vector.load %arg6[%c0_24, %c0_25, %c0_26] : memref<1x16x128xf32, #tpu.memory_space<vmem>>, vector<1x16x128xf32>
    %33 = vector.shape_cast %32 : vector<1x16x128xf32> to vector<16x128xf32>
    %34 = vector.shape_cast %31 : vector<16x128xf32> to vector<1x16x128xf32>
    tpu.vector_store %arg6[%c0_24, %c0_25, %c0_26], %34 {strides = array<i32>} : memref<1x16x128xf32, #tpu.memory_space<vmem>>, vector<1x16x128xf32>,
    return
  }
  func.func @transform_0(%arg0: i32) -> (i32, i32, i32) {
    %c0_i32 = arith.constant 0 : i32
    %c0_i32_0 = arith.constant 0 : i32
    %c0_i32_1 = arith.constant 0 : i32
    return %arg0, %c0_i32, %c0_i32_0 : i32, i32, i32
  }
  func.func @transform_1(%arg0: i32) -> (i32, i32) {
    %c0_i32 = arith.constant 0 : i32
    %c0_i32_0 = arith.constant 0 : i32
    %c0_i32_1 = arith.constant 0 : i32
    return %c0_i32, %c0_i32_0 : i32, i32
  }
  func.func @transform_2(%arg0: i32) -> (i32, i32) {
    %c0_i32 = arith.constant 0 : i32
    %c0_i32_0 = arith.constant 0 : i32
    %c0_i32_1 = arith.constant 0 : i32
    return %c0_i32, %c0_i32_0 : i32, i32
  }
  func.func @transform_3(%arg0: i32) -> (i32, i32) {
    %c0_i32 = arith.constant 0 : i32
    %c0_i32_0 = arith.constant 0 : i32
    %c0_i32_1 = arith.constant 0 : i32
    return %c0_i32, %c0_i32_0 : i32, i32
  }
  func.func @transform_4(%arg0: i32) -> (i32, i32) {
    %c0_i32 = arith.constant 0 : i32
    %c0_i32_0 = arith.constant 0 : i32
    %c0_i32_1 = arith.constant 0 : i32
    return %c0_i32, %c0_i32_0 : i32, i32
  }
  func.func @transform_5(%arg0: i32) -> (i32, i32, i32) {
    %c0_i32 = arith.constant 0 : i32
    %c0_i32_0 = arith.constant 0 : i32
    %c0_i32_1 = arith.constant 0 : i32
    return %arg0, %c0_i32, %c0_i32_0 : i32, i32, i32
  }
}

</mosaic_0001>

<bundles_post_ra>
// kernel: darknet_block.1
= control target key start
LH: loop header
LB: loop body
LE: loop exit
PB: predicated region body
PF: predicated region fallthrough
CT: control target
= control target key end

     0   :  { %s728_s18 = smov 0   ;;  %s833_s0 = inlined_call_operand.vmem [shape: f32[2,16,128], index: 0, kind: input, shape index: {}]   ;;  %s834_s1 = inlined_call_operand.vmem [shape: bf16[128,64], index: 1, kind: input, shape index: {}]   ;;  %s835_s2 = inlined_call_operand.vmem [shape: f32[1,64], index: 2, kind: input, shape index: {}]   ;;  %s836_s3 = inlined_call_operand.vmem [shape: bf16[192,128], index: 3, kind: input, shape index: {}]   ;;  %s837_s4 = inlined_call_operand.vmem [shape: f32[1,128], index: 4, kind: input, shape index: {}]   ;;  %s838_s5 = inlined_call_operand.vmem [shape: f32[2,16,128], index: 5, kind: output, shape index: {}]  }
   0x1 LB: > { %s584_s19 = sadd.s32 4294967295, %s692_s18   ;;  %p588_p0 = scmp.ge.s32.totalorder %s692_s18, 1  ;;  %s692_s18 = sphi %s728_s18, %s15_s18  }
   0x2   : > { %p187_p1 = scmp.lt.s32.totalorder %s692_s18, 3 }
   0x4   : > { %p188_p2 = pnand %p588_p0, %p187_p1 }
   0x5   : > { %v666_v0 = vld [vmem:[%s834_s1] sm:$0xff] (!%p188_p2)   ;;  %v694_v1 = vmov (!%p188_p2), 0.0   ;;  %v667_v2 = vld [vmem:[%s834_s1 + $0x8] sm:$0xff] (!%p188_p2)   ;;  %vm695_vm0 = vmmov (!%p188_p2), 0   ;;  %p215_p3 = scmp.lt.s32.totalorder (!%p188_p2), %s584_s19, 1  ;;  %v668_v3 = vld [vmem:[%s834_s1 + $0x10] sm:$0xff] (!%p188_p2)  }
   0x6   : > { %191 = sbr.rel (%p188_p2) target bundleno = 610 (0x262), region = 40  ;;  %629 = vmatprep.subr.bf16.mxu0 (!%p188_p2), %v694_v1  ;;  %645 = vmatprep.mubr.msk.bf16.mxu0 (!%p188_p2), %vm695_vm0, %v694_v1  ;;  %v669_v4 = vld [vmem:[%s834_s1 + $0x18] sm:$0xff] (!%p188_p2)   ;;  %v670_v5 = vld [vmem:[%s834_s1 + $0x20] sm:$0xff] (!%p188_p2)   ;;  %v671_v6 = vld [vmem:[%s834_s1 + $0x28] sm:$0xff] (!%p188_p2)   ;;  %vm347_vm1 = vcmask (!%p188_p2), 523264   ;;  %vm350_vm2 = vcmask (!%p188_p2), 517120  }
   0x7   : > { %630 = vmatpush3.bf16.msra.mxu0 (!%p188_p2), %v666_v0  ;;  %v672_v7 = vld [vmem:[%s834_s1 + $0x30] sm:$0xff] (!%p188_p2)   ;;  %v673_v8 = vld [vmem:[%s834_s1 + $0x38] sm:$0xff] (!%p188_p2)   ;;  %348 = vst.msk [vmem:[#allocation2] sm:$0xff] (!%p188_p2), %vm347_vm1, %v694_v1  ;;  %349 = vst.msk [vmem:[#allocation2 + $0x8] sm:$0xff] (!%p188_p2), %vm347_vm1, %v694_v1  ;;  %v696_v13 = vmov (!%p188_p2), 0   ;;  %s697_s21 = smov (!%p188_p2), 64  }
   0x8   : > { %631 = vmatprep.subr.bf16.mxu0 (!%p188_p2), %v694_v1  ;;  %351 = vst.msk [vmem:[#allocation2 + $0x10] sm:$0x3] (!%p188_p2), %vm350_vm2, %v694_v1  ;;  %v674_v12 = vld [vmem:[%s836_s3] sm:$0xff] (!%p188_p2)   ;;  %478 = vmatprep.subr.bf16.mxu1 (!%p188_p2), %v696_v13  ;;  %v675_v14 = vld [vmem:[%s836_s3 + $0x8] sm:$0xff] (!%p188_p2)   ;;  %v676_v15 = vld [vmem:[%s836_s3 + $0x10] sm:$0xff] (!%p188_p2)  }
   0x9   : > { %479 = vmatpush1.bf16.msra.mxu1 (!%p188_p2), %v674_v12  ;;  %v677_v16 = vld [vmem:[%s836_s3 + $0x18] sm:$0xff] (!%p188_p2)   ;;  %v678_v17 = vld [vmem:[%s836_s3 + $0x20] sm:$0xff] (!%p188_p2)   ;;  %v679_v18 = vld [vmem:[%s836_s3 + $0x28] sm:$0xff] (!%p188_p2)  }
   0xa   : > { %480 = vmatprep.subr.bf16.mxu1 (!%p188_p2), %v696_v13  ;;  %v680_v19 = vld [vmem:[%s836_s3 + $0x30] sm:$0xff] (!%p188_p2)   ;;  %v681_v20 = vld [vmem:[%s836_s3 + $0x38] sm:$0xff] (!%p188_p2)   ;;  %v682_v21 = vld [vmem:[%s836_s3 + $0x40] sm:$0xff] (!%p188_p2)  }
   0xb   : > { %632 = vmatpush3.bf16.msra.mxu0 (!%p188_p2), %v667_v2  ;;  %v683_v22 = vld [vmem:[%s836_s3 + $0x48] sm:$0xff] (!%p188_p2)   ;;  %v684_v23 = vld [vmem:[%s836_s3 + $0x50] sm:$0xff] (!%p188_p2)   ;;  %v593_v24 = vld [vmem:[%s835_s2] ss:$0 sm:$0xff] (!%p188_p2) }
   0xc   : > { %633 = vmatprep.subr.bf16.mxu0 (!%p188_p2), %v694_v1  ;;  %v685_v34 = vld [vmem:[%s836_s3 + $0x58] sm:$0xff] (!%p188_p2)   ;;  %v602_v50 = vld [vmem:[%s837_s4] ss:$0 sm:$0xff] (!%p188_p2) }
   0xd   : > { %s840_s19 = smov (!%p215_p3, %s584_s19), 1  ;;  %481 = vmatpush1.bf16.msra.mxu1 %v675_v14 }
   0xe   : > { %s618_s7 = sshll.u32 %s840_s19, 4  ;;  %482 = vmatprep.subr.bf16.mxu1 %v696_v13 }
   0xf   : > { %634 = vmatpush3.bf16.msra.mxu0 %v668_v3  ;;  %s219_s12 = scalar_lea.vmem %s833_s0, %s618_s7  ;;  %s224_s26 = scalar_lea.vmem %s838_s5, %s618_s7 }
  0x10   : > { %635 = vmatprep.subr.bf16.mxu0 %v694_v1  ;;  %v768_v9 = vld [vmem:[%s219_s12] sm:$0xff]  ;;  %v770_v10 = vld [vmem:[%s219_s12 + $0x8] sm:$0xff] }
  0x11   : > { %v228_v11 = vpack.c.bf16 %v770_v10, %v768_v9  ;;  %483 = vmatpush1.bf16.msra.mxu1 %v676_v15 }
  0x12   : > { %484 = vmatprep.subr.bf16.mxu1 %v696_v13 }
  0x13   : > { %636 = vmatpush3.bf16.msra.mxu0 %v669_v4 }
  0x14   : > { %637 = vmatprep.subr.bf16.mxu0 %v694_v1 }
  0x15   : > { %485 = vmatpush1.bf16.msra.mxu1 %v677_v16 }
  0x16   : > { %486 = vmatprep.subr.bf16.mxu1 %v696_v13 }
  0x17   : > { %638 = vmatpush3.bf16.msra.mxu0 %v670_v5 }
  0x18   : > { %639 = vmatprep.subr.bf16.mxu0 %v694_v1 }
  0x19   : > { %487 = vmatpush1.bf16.msra.mxu1 %v678_v17 }
  0x1a   : > { %488 = vmatprep.subr.bf16.mxu1 %v696_v13 }
  0x1b   : > { %640 = vmatpush3.bf16.msra.mxu0 %v671_v6 }
  0x1c   : > { %641 = vmatprep.subr.bf16.mxu0 %v694_v1 }
  0x1d   : > { %489 = vmatpush1.bf16.msra.mxu1 %v679_v18 }
  0x1e   : > { %490 = vmatprep.subr.bf16.mxu1 %v696_v13 }
  0x1f   : > { %642 = vmatpush3.bf16.msra.mxu0 %v672_v7 }
  0x20   : > { %643 = vmatprep.subr.bf16.mxu0 %v694_v1 }
  0x21   : > { %491 = vmatpush1.bf16.msra.mxu1 %v680_v19 }
  0x22   : > { %492 = vmatprep.subr.bf16.mxu1 %v696_v13 }
  0x23   : > { %644 = vmatpush3.bf16.msra.mxu0 %v673_v8 }
  0x25   : > { %493 = vmatpush1.bf16.msra.mxu1 %v681_v20 }
  0x26   : > { %646 = vmatmul.mubr.bf16.vlgmr.msra.gmra.mrb[0].mxu0 %v228_v11  ;;  %494 = vmatprep.subr.bf16.mxu1 %v696_v13 }
  0x29   : > { %495 = vmatpush1.bf16.msra.mxu1 %v682_v21 }
  0x2a   : > { %496 = vmatprep.subr.bf16.mxu1 %v696_v13 }
  0x2d   : > { %497 = vmatpush1.bf16.msra.mxu1 %v683_v22 }
  0x2e   : > { %498 = vmatprep.subr.bf16.mxu1 %v696_v13 }
  0x31   : > { %499 = vmatpush1.bf16.msra.mxu1 %v684_v23 }
  0x32   : > { %500 = vmatprep.subr.bf16.mxu1 %v696_v13 }
  0x35   : > { %501 = vmatpush1.bf16.msra.mxu1 %v685_v34 }
  0xf9   : > { %v334_v25 = vpop.f32.mrb[0].mxu0 }
  0xfa   : > { %v335_v26 = vadd.f32 %v593_v24, %v334_v25  ;;  %v647_v27 = vpop.f32.mrb[1].mxu0 }
  0xfb   : > { %v337_v28 = vpop.f32.mrb[2].mxu0 }
  0xfc   : > { %vm341_vm3 = vcmp.gt.f32.partialorder %v335_v26, 0.0  ;;  %v343_v29 = vmul.f32 0.1, %v335_v26  ;;  %v338_v30 = vadd.f32 %v593_v24, %v337_v28  ;;  %v648_v31 = vpop.f32.mrb[3].mxu0 }
  0xfe   : > { %v345_v32 = vsel %vm341_vm3, %v335_v26, %v343_v29  ;;  %vm342_vm4 = vcmp.gt.f32.partialorder %v338_v30, 0.0  ;;  %v344_v33 = vmul.f32 0.1, %v338_v30 }
  0xff   : > { %352 = vst.msk [vmem:[#allocation2 + $0x1] sm:$0xff] %vm347_vm1, %v345_v32 }
 0x100   : > { %v346_v35 = vsel %vm342_vm4, %v338_v30, %v344_v33 }
 0x101   : > { %353 = vst.msk [vmem:[#allocation2 + $0x9] sm:$0xff] %vm347_vm1, %v346_v35 }
 0x106   : > { %v356_v36 = vld [vmem:[#allocation2 + $0x1] sm:$0xff] }
 0x107   : > { %v354_v45 = vld [vmem:[#allocation2] sm:$0xff] }
 0x108   : > { %v358_v37 = vld [vmem:[#allocation2 + $0x2] sm:$0xff]  ;;  %v359_v38 = vld [vmem:[#allocation2 + $0xa] sm:$0xff] }
 0x109   : > { %v357_v39 = vld [vmem:[#allocation2 + $0x9] sm:$0xff]  ;;  %v371_v40 = vpack.c.bf16 %v359_v38, %v358_v37 }
 0x10a   : > { %v661_v41 = vpack.i.bf16 %v357_v39, %v356_v36  ;;  %v355_v46 = vld [vmem:[#allocation2 + $0x8] sm:$0xff] }
 0x10b   : > { %615 = vmatprep.mubr.msk.bf16.mxu1 %vm347_vm1, %v371_v40 }
 0x10c   : > { %662 = vrot.lane.b32.xlu0 %v661_v41, %s697_s21 }
 0x17e   : > { %v663_v42 = vpop.permute.xlu0 %662 }
 0x17f   : > { %v665_v43 = vunpack.i.h.bf16 %v663_v42  ;;  %v664_v44 = vunpack.i.l.bf16 %v663_v42 }
 0x181   : > { %v368_v47 = vsel %vm347_vm1, %v354_v45, %v664_v44  ;;  %v369_v48 = vsel %vm347_vm1, %v355_v46, %v665_v43 }
 0x182   : > { %v370_v49 = vpack.c.bf16 %v369_v48, %v368_v47 }
 0x184   : > { %511 = vmatmul.mubr.bf16.vlgmr.msra.gmra.mrb[0].mxu1 %v370_v49 }
 0x257   : > { %v512_v51 = vpop.f32.mrb[0].mxu1 }
 0x258   : > { %v513_v52 = vadd.f32 %v602_v50, %v512_v51  ;;  %v514_v53 = vpop.f32.mrb[1].mxu1 }
 0x259   : > { %v515_v54 = vpop.f32.mrb[2].mxu1 }
 0x25a   : > { %vm519_vm5 = vcmp.gt.f32.partialorder %v513_v52, 0.0  ;;  %v521_v55 = vmul.f32 0.1, %v513_v52  ;;  %v516_v56 = vadd.f32 %v602_v50, %v515_v54  ;;  %v517_v57 = vpop.f32.mrb[3].mxu1 }
 0x25c   : > { %v523_v58 = vsel %vm519_vm5, %v513_v52, %v521_v55  ;;  %vm520_vm6 = vcmp.gt.f32.partialorder %v516_v56, 0.0  ;;  %v522_v59 = vmul.f32 0.1, %v516_v56 }
 0x25d   : > { %v525_v60 = vadd.f32 %v523_v58, %v768_v9 }
 0x25e   : > { %v524_v61 = vsel %vm520_vm6, %v516_v56, %v522_v59 }
 0x25f   : > { %527 = vst [vmem:[%s224_s26] sm:$0xff] %v525_v60  ;;  %v526_v62 = vadd.f32 %v524_v61, %v770_v10 }
 0x261   : > { %528 = vst [vmem:[%s224_s26 + $0x8] sm:$0xff] %v526_v62 }
 0x262 PF: > { %s15_s18 = sadd.s32 1, %s692_s18  }
 0x263   : > { %p12_p4 = scmp.ge.s32.totalorder %s15_s18, 4  }
 0x265   :  { %14 = sbr.rel (!%p12_p4) target bundleno = 1 (0x1), region = 70 }

</bundles_post_ra>
